<compile_context>
chip_gen: v6e
topology: v6e:2x2x1
jax: 0.10.0
libtpu: 0.0.40
codegen_flags: <defaults>
</compile_context>

<pallas_src>
import functools

import jax
import jax.numpy as jnp
from jax import lax
from jax.experimental import pallas as pl
from jax.experimental.pallas import tpu as pltpu


def _round_up(x, m):
    return (x + m - 1) // m * m


def _conv_wrap_kernel(xc_ref, xn_ref, w_ref, b_ref, y_ref):
    """One (batch row, sequence chunk) tile of ConvWrap(nn.Conv1d).

    xc_ref : (1, TL, Cin)   current padded-input chunk
    xn_ref : (1, TL, Cin)   next padded-input chunk (conv halo)
    w_ref  : (K, Cin, Cout) per-tap weights, pre-transposed for x @ W
    b_ref  : (1, Cout)      bias
    y_ref  : (1, TL, Cout)  output chunk (channel-last == already "permuted back")
    """
    TL = xc_ref.shape[1]
    K = w_ref.shape[0]
    C_out = w_ref.shape[2]

    # Current chunk + halo rows from the next chunk.
    xcat = jnp.concatenate([xc_ref[0], xn_ref[0]], axis=0)        # (2*TL, Cin)

    acc = jnp.zeros((TL, C_out), jnp.float32)
    for k in range(K):  # static, unrolled: K independent MXU GEMMs per chunk
        acc = acc + jnp.dot(xcat[k:k + TL, :], w_ref[k],
                            preferred_element_type=jnp.float32)
    y_ref[0] = (acc + b_ref[...]).astype(y_ref.dtype)


@functools.partial(jax.jit, static_argnames=("pad",))
def conv_wrap_forward(x, w_packed, bias, *, pad):
    """ConvWrap(nn.Conv1d(Cin, Cout, K, padding=pad, stride=1)) forward.

    x        : (B, L, Cin)  float32 (the (B, seq, feat) tensor ConvWrap receives)
    w_packed : (K, Cin, Cout)  pre-packed Conv1d weight (repacked once at load time)
    bias     : (Cout,)
    returns  : (B, L_out, Cout) with L_out = L + 2*pad - K + 1
    """
    B, L, C_in = x.shape
    K, _, C_out = w_packed.shape
    L_out = L + 2 * pad - K + 1

    # Sequence chunk: multiple of 8 (sublane tiling), >= K, capped for VMEM.
    TL = max(_round_up(min(max(L_out, 1), 512), 8), _round_up(K, 8))
    N = pl.cdiv(L_out, TL)        # grid steps along the sequence
    Lp = (N + 1) * TL             # padded input rows (extra block = halo for last chunk)
    assert Lp - L - pad >= 0

    # Zero padding for the conv + halo block; kernel reads padded rows [l, l+K).
    x_pad = jnp.pad(x, ((0, 0), (pad, Lp - L - pad), (0, 0)))
    bias2 = bias.reshape(1, C_out).astype(jnp.float32)

    grid_spec = pltpu.PrefetchScalarGridSpec(
        num_scalar_prefetch=0,
        grid=(B, N),
        in_specs=[
            pl.BlockSpec((1, TL, C_in), lambda b, i: (b, i, 0)),      # current chunk
            pl.BlockSpec((1, TL, C_in), lambda b, i: (b, i + 1, 0)),  # halo chunk
            pl.BlockSpec((K, C_in, C_out), lambda b, i: (0, 0, 0)),   # weights (resident)
            pl.BlockSpec((1, C_out), lambda b, i: (0, 0)),            # bias
        ],
        out_specs=pl.BlockSpec((1, TL, C_out), lambda b, i: (b, i, 0)),
    )

    # Explicit scoped-VMEM limit derived from the chosen chunk size (v5e default is 16 MiB).
    elt = jnp.dtype(x.dtype).itemsize
    work_bytes = 2 * 2 * (2 * TL * C_in + TL * C_out) * elt          # double-buffered x(x2) + y
    work_bytes += 2 * (K * C_in * C_out + C_out) * 4                 # weights + bias
    vmem_limit = int(min(64 * 1024 * 1024, max(32 * 1024 * 1024, 4 * work_bytes)))

    y = pl.pallas_call(
        _conv_wrap_kernel,
        out_shape=jax.ShapeDtypeStruct((B, N * TL, C_out), x.dtype),
        grid_spec=grid_spec,
        compiler_params=pltpu.CompilerParams(
            dimension_semantics=("parallel", "parallel"),
            vmem_limit_bytes=vmem_limit,
        ),
    )(x_pad, x_pad, w_packed, bias2)

    return y[:, :L_out, :]


def _conv_wrap_ref(x, w_pt, b_pt, pad):
    """Pure-JAX reference with ConvWrap's explicit permutes (PyTorch Conv1d semantics)."""
    xp = jnp.transpose(x, (0, 2, 1))                         # x.permute(0, 2, 1)
    y = lax.conv_general_dilated(
        xp, w_pt, window_strides=(1,), padding=[(pad, pad)],
        dimension_numbers=("NCH", "OIH", "NCH"))
    y = y + b_pt[None, :, None]
    return jnp.transpose(y, (0, 2, 1))                       # z_out.permute(0, 2, 1)


if __name__ == "__main__":
    import numpy as np

    batch, seq, c_in, c_out, ksize, pad = 2, 16, 4, 32, 3, 1

    key = jax.random.PRNGKey(0)
    kx, kw, kb = jax.random.split(key, 3)

    # ConvWrap input: (batch, seq, channels).
    x = jax.random.normal(kx, (batch, seq, c_in), jnp.float32)

    # nn.Conv1d(c_in, c_out, ksize, padding=pad) parameters, PyTorch-style init:
    # U(-sqrt(k), sqrt(k)) with k = 1 / (c_in * ksize).  Weight layout (Cout, Cin, K).
    bound = 1.0 / jnp.sqrt(jnp.float32(c_in * ksize))
    w_pt = jax.random.uniform(kw, (c_out, c_in, ksize), jnp.float32, -bound, bound)
    b_pt = jax.random.uniform(kb, (c_out,), jnp.float32, -bound, bound)

    # Repack ONCE at parameter-load time (not per forward call): (Cout,Cin,K) -> (K,Cin,Cout).
    w_packed = jnp.transpose(w_pt, (2, 1, 0))

    out = conv_wrap_forward(x, w_packed, b_pt, pad=pad)
    out = jax.block_until_ready(out)
    l_out = seq + 2 * pad - ksize + 1
    assert out.shape == (batch, l_out, c_out), out.shape

    ref = jax.block_until_ready(_conv_wrap_ref(x, w_pt, b_pt, pad))
    np.testing.assert_allclose(np.asarray(out), np.asarray(ref), rtol=1e-5, atol=1e-5)

    print("KERNEL_OK")
</pallas_src>

<mosaic_0001>
module attributes {stable_mosaic.version = 11 : i64} {
  func.func @_conv_wrap_kernel(%arg0: i32, %arg1: i32, %arg2: memref<1x16x4xf32, #tpu.memory_space<vmem>>, %arg3: memref<1x16x4xf32, #tpu.memory_space<vmem>>, %arg4: memref<3x4x32xf32, #tpu.memory_space<vmem>>, %arg5: memref<1x32xf32, #tpu.memory_space<vmem>>, %arg6: memref<1x16x32xf32, #tpu.memory_space<vmem>>) attributes {dimension_semantics = [#tpu.dimension_semantics<parallel>, #tpu.dimension_semantics<parallel>], iteration_bounds = array<i64: 2, 1>, scalar_prefetch = 0 : i64, scratch_operands = 0 : i64, tpu.core_type = #tpu.core_type<tc>, window_params = [{transform_indices = @transform_0, window_bounds = array<i64: 1, 16, 4>}, {transform_indices = @transform_1, window_bounds = array<i64: 1, 16, 4>}, {pipeline_mode = #tpu.pipeline_mode<synchronous>, transform_indices = @transform_2, window_bounds = array<i64: 3, 4, 32>}, {pipeline_mode = #tpu.pipeline_mode<synchronous>, transform_indices = @transform_3, window_bounds = array<i64: 1, 32>}, {transform_indices = @transform_4, window_bounds = array<i64: 1, 16, 32>}]} {
    %c0 = arith.constant 0 : index
    %c0_0 = arith.constant 0 : index
    %c0_1 = arith.constant 0 : index
    %0 = vector.load %arg2[%c0, %c0_0, %c0_1] : memref<1x16x4xf32, #tpu.memory_space<vmem>>, vector<1x16x4xf32>
    %1 = vector.shape_cast %0 : vector<1x16x4xf32> to vector<16x4xf32>
    %c0_2 = arith.constant 0 : index
    %c0_3 = arith.constant 0 : index
    %c0_4 = arith.constant 0 : index
    %2 = vector.load %arg3[%c0_2, %c0_3, %c0_4] : memref<1x16x4xf32, #tpu.memory_space<vmem>>, vector<1x16x4xf32>
    %3 = vector.shape_cast %2 : vector<1x16x4xf32> to vector<16x4xf32>
    %4 = tpu.concatenate %1, %3 in 0 : vector<16x4xf32>, vector<16x4xf32> -> vector<32x4xf32>
    %cst = arith.constant 0.000000e+00 : f32
    %5 = vector.broadcast %cst : f32 to vector<16x32xf32>
    %6 = vector.extract_strided_slice %4 {offsets = [0, 0], sizes = [16, 4], strides = [1, 1]} : vector<32x4xf32> to vector<16x4xf32>
    %c0_5 = arith.constant 0 : index
    %c0_6 = arith.constant 0 : index
    %c0_7 = arith.constant 0 : index
    %7 = vector.load %arg4[%c0_5, %c0_6, %c0_7] : memref<3x4x32xf32, #tpu.memory_space<vmem>>, vector<1x4x32xf32>
    %8 = vector.shape_cast %7 : vector<1x4x32xf32> to vector<4x32xf32>
    %cst_8 = arith.constant dense<0.000000e+00> : vector<16x32xf32>
    %9 = tpu.matmul %6, %8, %cst_8 {dimension_numbers = #tpu.dot_dimension_numbers<[1], [0], [0], [1], [0, 0, 1, 1], [], []>} : vector<16x4xf32>, vector<4x32xf32>, vector<16x32xf32> -> vector<16x32xf32>
    %10 = arith.addf %5, %9 : vector<16x32xf32>
    %11 = vector.extract_strided_slice %4 {offsets = [1, 0], sizes = [16, 4], strides = [1, 1]} : vector<32x4xf32> to vector<16x4xf32>
    %c1 = arith.constant 1 : index
    %c0_9 = arith.constant 0 : index
    %c0_10 = arith.constant 0 : index
    %12 = vector.load %arg4[%c1, %c0_9, %c0_10] : memref<3x4x32xf32, #tpu.memory_space<vmem>>, vector<1x4x32xf32>
    %13 = vector.shape_cast %12 : vector<1x4x32xf32> to vector<4x32xf32>
    %cst_11 = arith.constant dense<0.000000e+00> : vector<16x32xf32>
    %14 = tpu.matmul %11, %13, %cst_11 {dimension_numbers = #tpu.dot_dimension_numbers<[1], [0], [0], [1], [0, 0, 1, 1], [], []>} : vector<16x4xf32>, vector<4x32xf32>, vector<16x32xf32> -> vector<16x32xf32>
    %15 = arith.addf %10, %14 : vector<16x32xf32>
    %16 = vector.extract_strided_slice %4 {offsets = [2, 0], sizes = [16, 4], strides = [1, 1]} : vector<32x4xf32> to vector<16x4xf32>
    %c2 = arith.constant 2 : index
    %c0_12 = arith.constant 0 : index
    %c0_13 = arith.constant 0 : index
    %17 = vector.load %arg4[%c2, %c0_12, %c0_13] : memref<3x4x32xf32, #tpu.memory_space<vmem>>, vector<1x4x32xf32>
    %18 = vector.shape_cast %17 : vector<1x4x32xf32> to vector<4x32xf32>
    %cst_14 = arith.constant dense<0.000000e+00> : vector<16x32xf32>
    %19 = tpu.matmul %16, %18, %cst_14 {dimension_numbers = #tpu.dot_dimension_numbers<[1], [0], [0], [1], [0, 0, 1, 1], [], []>} : vector<16x4xf32>, vector<4x32xf32>, vector<16x32xf32> -> vector<16x32xf32>
    %20 = arith.addf %15, %19 : vector<16x32xf32>
    %c0_15 = arith.constant 0 : index
    %c0_16 = arith.constant 0 : index
    %21 = vector.load %arg5[%c0_15, %c0_16] : memref<1x32xf32, #tpu.memory_space<vmem>>, vector<1x32xf32>
    %22 = vector.broadcast %21 : vector<1x32xf32> to vector<16x32xf32>
    %23 = arith.addf %20, %22 : vector<16x32xf32>
    %c0_17 = arith.constant 0 : index
    %c0_18 = arith.constant 0 : index
    %c0_19 = arith.constant 0 : index
    %24 = vector.load %arg6[%c0_17, %c0_18, %c0_19] : memref<1x16x32xf32, #tpu.memory_space<vmem>>, vector<1x16x32xf32>
    %25 = vector.shape_cast %24 : vector<1x16x32xf32> to vector<16x32xf32>
    %26 = vector.shape_cast %23 : vector<16x32xf32> to vector<1x16x32xf32>
    tpu.vector_store %arg6[%c0_17, %c0_18, %c0_19], %26 {strides = array<i32>} : memref<1x16x32xf32, #tpu.memory_space<vmem>>, vector<1x16x32xf32>,
    return
  }
  func.func @transform_0(%arg0: i32, %arg1: i32) -> (i32, i32, i32) {
    %c0_i32 = arith.constant 0 : i32
    %c0_i32_0 = arith.constant 0 : i32
    return %arg0, %arg1, %c0_i32 : i32, i32, i32
  }
  func.func @transform_1(%arg0: i32, %arg1: i32) -> (i32, i32, i32) {
    %c1_i32 = arith.constant 1 : i32
    %0 = arith.addi %arg1, %c1_i32 : i32
    %c0_i32 = arith.constant 0 : i32
    %c0_i32_0 = arith.constant 0 : i32
    return %arg0, %0, %c0_i32 : i32, i32, i32
  }
  func.func @transform_2(%arg0: i32, %arg1: i32) -> (i32, i32, i32) {
    %c0_i32 = arith.constant 0 : i32
    %c0_i32_0 = arith.constant 0 : i32
    %c0_i32_1 = arith.constant 0 : i32
    %c0_i32_2 = arith.constant 0 : i32
    return %c0_i32, %c0_i32_0, %c0_i32_1 : i32, i32, i32
  }
  func.func @transform_3(%arg0: i32, %arg1: i32) -> (i32, i32) {
    %c0_i32 = arith.constant 0 : i32
    %c0_i32_0 = arith.constant 0 : i32
    %c0_i32_1 = arith.constant 0 : i32
    return %c0_i32, %c0_i32_0 : i32, i32
  }
  func.func @transform_4(%arg0: i32, %arg1: i32) -> (i32, i32, i32) {
    %c0_i32 = arith.constant 0 : i32
    %c0_i32_0 = arith.constant 0 : i32
    return %arg0, %arg1, %c0_i32 : i32, i32, i32
  }
}

</mosaic_0001>

<bundles_post_ra>
// kernel: conv_wrap_forward.1
= control target key start
LH: loop header
LB: loop body
LE: loop exit
PB: predicated region body
PF: predicated region fallthrough
CT: control target
= control target key end

     0   :  { %9 = vsyncpa [#allocation3], 0  ;;  %s1030_s0 = inlined_call_operand.vmem [shape: f32[2,32,4], index: 0, kind: input, shape index: {}, may-alias: {0,1}]   ;;  %s1031_s1 = inlined_call_operand.vmem [shape: f32[2,32,4], index: 1, kind: input, shape index: {}, may-alias: {0,1}]   ;;  %s1032_s2 = inlined_call_operand.vmem [shape: f32[3,4,32], index: 2, kind: input, shape index: {}]   ;;  %s1033_s3 = inlined_call_operand.vmem [shape: f32[1,32], index: 3, kind: input, shape index: {}]   ;;  %s1034_s4 = inlined_call_operand.hbm [shape: f32[2,16,32], index: 4, kind: output, shape index: {}]  }
   0x1   :  { %11 = vsyncpa [#allocation3 + $0x1], 0  ;;  %s887_s15 = smov 0   ;;  %s889_s16 = smov 0  }
   0x2   :  { %s891_s17 = smov 0   ;;  %s893_s18 = smov 0  }
   0x3   :  { %s895_s19 = smov 0   ;;  %s897_s20 = smov 0  }
   0x4 LB: > { %s668_s21 = sadd.s32 4294967295, %s857_s20   ;;  %s669_s22 = sadd.s32 4294967294, %s857_s20   ;;  %s857_s20 = sphi %s897_s20, %s17_s20   ;;  %s853_s19 = sphi %s895_s19, %s1041_s19   ;;  %s849_s18 = sphi %s893_s18, %s1040_s18   ;;  %s845_s17 = sphi %s891_s17, %s1039_s17   ;;  %s841_s16 = sphi %s889_s16, %s1038_s16   ;;  %s837_s15 = sphi %s887_s15, %s1037_s15  }
   0x5   : > { %s29_s23 = sadd.s32 1, %s853_s19  ;;  %s138_s24 = sadd.s32 1, %s845_s17 }
   0x6   : > { %p31_p0 = scmp.ge.s32.totalorder %s29_s23, 2  ;;  %p148_p1 = scmp.ne.s32.totalorder %s845_s17, %s841_s16 }
   0x7   : > { %p149_p2 = scmp.eq.s32.totalorder %s668_s21, 1  ;;  %p154_p3 = scmp.ne.s32.totalorder %s841_s16, %s837_s15 }
   0x8   : > { %s1043_s23 = smov (%p31_p0, %s29_s23), 0  ;;  %p155_p5 = scmp.eq.s32.totalorder %s669_s22, 1 }
   0x9   : > { %p927_p4 = por %p149_p2, %p148_p1  ;;  %s133_s26 = ssub.s32 %s853_s19, %s1043_s23 }
   0xa   : > { %p672_p6 = scmp.ge.s32.totalorder %s857_s20, 1  ;;  %p136_p7 = scmp.eq.s32.totalorder %s133_s26, 0 }
   0xb   : > { %p934_p8 = por %p155_p5, %p154_p3  ;;  %p207_p9 = scmp.lt.s32.totalorder %s857_s20, 3 }
   0xc   : > { %s940_s28 = scalar_select %p136_p7, %s845_s17, %s138_s24  }
   0xd   : > { %p208_p10 = pnand %p672_p6, %p207_p9 }
   0xe   : > { %p248_p11 = scmp.lt.s32.totalorder (!%p208_p10), %s849_s18, 1  ;;  %s244_s26 = sand.u32 (!%p208_p10), 1, %s841_s16  }
   0xf   : > { %211 = sbr.rel (%p208_p10) target bundleno = 246 (0xf6), region = 36  ;;  %s673_s29 = sshll.u32 (!%p208_p10), %s244_s26, 4 }
  0x10   : > { %s246_s6 = scalar_lea.vmem (!%p208_p10), [#allocation2], %s673_s29  ;;  %s698_s8 = sshll.u32 (!%p208_p10), %s849_s18, 8 }
  0x11   : > { %s571_s7 = sshll.u32 (!%p208_p10), %s246_s6, 4  ;;  %s981_s11 = scalar_lea.hbm (!%p208_p10), %s1034_s4, %s698_s8  ;;  %s983_s7 = int_to_ptr.vmem [resolvable:$true] %s571_s7 }
  0x12   : > { %s985_s12 = scalar_lea.sflag (!%p208_p10), [#allocation3], %s244_s26 }
  0x14   : > { %v678_v0 = vld [vmem:[%s1032_s2 + $0x4] sm:$0xf]  ;;  %vm290_vm0 = vcmask 1043456   ;;  %v273_v1 = vld [vmem:[%s1032_s2] sm:$0xf]  ;;  %s249_s9 = scalar_select %p248_p11, %s849_s18, 1 }
  0x15   : > { %709 = vmatprep.subr.msk.mxu0 %vm290_vm0, %v678_v0  ;;  %714 = vmatprep.subr.msk.mxu1 %vm290_vm0, %v273_v1  ;;  %v685_v2 = vld [vmem:[%s1032_s2 + $0x8] sm:$0xf]  ;;  %vm285_vm1 = vcmask 31744   ;;  %vm279_vm2 = vcmask 1046528   ;;  %vm453_vm3 = vcmask 1045504   ;;  %vm552_vm4 = vcmask 261120  }
  0x16   : > { %710 = vmatpush3.msk.msra.mxu0 %vm290_vm0, %v678_v0  ;;  %715 = vmatpush3.msk.msra.mxu1 %vm290_vm0, %v273_v1  ;;  %s695_s10 = sshll.u32 %s249_s9, 5  ;;  %v689_v22 = vld [vmem:[%s1033_s3] ss:$0 sm:$0xff]  ;;  %s781_s18 = scalar_lea.vmem %s983_s7, 256 }
  0x17   : > { %719 = vmatprep.subr.msk.mxu0 %vm290_vm0, %v685_v2  ;;  %s255_s13 = scalar_lea.vmem %s1030_s0, %s695_s10  ;;  %s697_s14 = sadd.s32 16, %s695_s10 }
  0x18   : > { %v270_v3 = vld [vmem:[%s255_s13] sm:$0xff]  ;;  %v271_v4 = vld [vmem:[%s255_s13 + $0x8] sm:$0xff]  ;;  %s266_s24 = scalar_lea.vmem %s1031_s1, %s697_s14  ;;  %p782_p12 = scmp.ne.s32.totalorder %s983_s7, %s781_s18 }
  0x19   : > { %v280_v5 = vrot.slane %v270_v3, 1  ;;  %v281_v6 = vrot.slane %v271_v4, 1  ;;  %716 = vmatprep.mubr.msk.f32.mxu1 %vm285_vm1, %v270_v3  ;;  %v272_v7 = vld [vmem:[%s266_s24] sm:$0xff]  ;;  %v454_v8 = vrot.slane %v270_v3, 2  ;;  %v455_v9 = vrot.slane %v271_v4, 2  ;;  %s859_s13 = smov [#allocation2]  }
  0x1a   : > { %v283_v10 = vrot.slane %v272_v7, 1  ;;  %v457_v11 = vrot.slane %v272_v7, 2  ;;  %717 = vmatmul.mubr.msk.f32.vlgmr.msra.gmra.mxu1 %vm285_vm1, %v271_v4  ;;  %p783_p13 = pnand %p782_p12, %p927_p4  ;;  %s785_s14 = sshll.u32 %s859_s13, 4  ;;  %s786_s14 = int_to_ptr.vmem [resolvable:$false] %s785_s14 }
  0x1b   : > { %v282_v12 = vsel %vm279_vm2, %v280_v5, %v281_v6  ;;  %v456_v13 = vsel %vm453_vm3, %v454_v8, %v455_v9  ;;  %s787_s21 = scalar_lea.vmem %s786_s14, 512  ;;  %p788_p1 = scmp.lt.s32.totalorder %s983_s7, %s786_s14 }
  0x1c   : > { %711 = vmatprep.mubr.msk.f32.mxu0 %vm285_vm1, %v282_v12  ;;  %v284_v14 = vsel %vm279_vm2, %v281_v6, %v283_v10  ;;  %v458_v15 = vsel %vm453_vm3, %v455_v9, %v457_v11  ;;  %p784_p0 = pneg %p783_p13  ;;  %p789_p2 = scmp.lt.s32.totalorder %s787_s21, %s781_s18 }
  0x1d   : > { %712 = vmatmul.mubr.msk.f32.vlgmr.msra.gmra.mxu0 %vm285_vm1, %v284_v14 }
  0x1e   : > { %720 = vmatpush3.msk.msra.mxu0 %vm290_vm0, %v685_v2  ;;  %721 = vmatprep.mubr.msk.f32.mxu0 %vm285_vm1, %v456_v13  ;;  %p790_p3 = por %p789_p2, %p788_p1 }
  0x20   : > { %p791_p5 = pnand %p790_p3, %p784_p0 }
  0x21   : > { %722 = vmatmul.mubr.msk.f32.vlgmr.msra.gmra.mxu0 %vm285_vm1, %v458_v15 }
  0xda   : > { %v718_v16 = vpop.f32.mrf.mxu1 }
  0xdc   : > { %v442_v19 = vpop.f32.mrf.mxu1 }
  0xdd   : > { %v713_v17 = vpop.f32.mrf.mxu0 }
  0xde   : > { %v448_v20 = vadd.f32 %v718_v16, %v713_v17 }
  0xdf   : > { %v360_v18 = vpop.f32.mrf.mxu0 }
  0xe0   : > { %v443_v23 = vadd.f32 %v442_v19, %v360_v18 }
  0xe1   : > { %v723_v21 = vpop.f32.mrf.mxu0 }
  0xe2   : > { %v542_v24 = vadd.f32 %v723_v21, %v448_v20 }
  0xe3   : > { %v532_v25 = vpop.f32.mrf.mxu0 }
  0xe4   : > { %v551_v26 = vadd.f32 %v689_v22, %v542_v24  ;;  %v541_v27 = vadd.f32 %v532_v25, %v443_v23 }
  0xe6   : > { %554 = vst.msk [vmem:[%s246_s6 + $0x8] sm:$0xff] %vm552_vm4, %v551_v26  ;;  %v550_v28 = vadd.f32 %v689_v22, %v541_v27 }
  0xe8   : > { %553 = vst.msk [vmem:[%s246_s6] sm:$0xff] %vm552_vm4, %v550_v28 }
  0xe9   : > { %794 = shalt.err (!%p791_p5)
}
  0xea   : > { %s795_s22 = scalar_lea.hbm %s981_s11, 256  ;;  %s799_s29 = scalar_lea.hbm %s1034_s4, 512 }
  0xeb   : > { %p796_p6 = scmp.ne.s32.totalorder %s981_s11, %s795_s22  ;;  %p800_p10 = scmp.lt.s32.totalorder %s981_s11, %s1034_s4 }
  0xec   : > { %p801_p11 = scmp.lt.s32.totalorder %s799_s29, %s795_s22 }
  0xed   : > { %p797_p7 = pnand %p796_p6, %p927_p4 }
  0xee   : > { %p802_p12 = por %p801_p11, %p800_p10 }
  0xef   : > { %p798_p9 = pneg %p797_p7 }
  0xf1   : > { %p803_p13 = pnand %p802_p12, %p798_p9 }
  0xf3   : > { %806 = shalt.err (!%p803_p13)
}
  0xf4   : > { %s860_s6 = smov 128   ;;  %s861_s8 = smov 8  }
  0xf5   : > { %724 = dma.vmem_to_hbm [thread:$0]  (%p927_p4), %s983_s7, 256, %s981_s11, %s985_s12, %s860_s6, %s860_s6, %s861_s8  }
  0xf6 PF: > { %p730_p0 = scmp.ge.s32.totalorder %s857_s20, 2  ;;  %s586_s9 = sand.u32 1, %s837_s15  }
  0xf7   : > { %s587_s10 = scalar_lea.sflag [#allocation3], %s586_s9 }
  0xf8   : > { %p727_p1 = pnand %p730_p0, %p934_p8 }
  0xfa   : > { %p728_p2 = pneg %p727_p1 }
  0xfc   : > { %832 = dma.done.wait (%p728_p2), %s587_s10, 256  }
  0xfd   : > { %834 = vsyncadd (%p728_p2), %s587_s10, 4294967040  ;;  %s17_s20 = sadd.s32 1, %s857_s20   ;;  %s1037_s15 = smov %s841_s16 }
  0xfe   : > { %p14_p3 = scmp.ge.s32.totalorder %s17_s20, 4   ;;  %s1038_s16 = smov %s845_s17 }
  0xff   : > { %s1039_s17 = smov %s940_s28  ;;  %s1040_s18 = smov %s853_s19 }
 0x100   : > { %s1041_s19 = smov %s1043_s23  ;;  %16 = sbr.rel (!%p14_p3) target bundleno = 4 (0x4), region = 76 }
 0x105   :  { %592 = vsyncpa [#allocation3], 1 }
 0x106   :  { %594 = vsyncpa [#allocation3 + $0x1], 1 }

</bundles_post_ra>
